<compile_context>
chip_gen: v7x
topology: tpu7x:2x2x1
jax: 0.10.0
libtpu: 0.0.40
codegen_flags: <defaults>
</compile_context>

<pallas_src>
import functools

import jax
import jax.numpy as jnp
from jax.experimental import pallas as pl
from jax.experimental.pallas import tpu as pltpu


_LANE = 128            # weight output dims padded to a multiple of this (lane-dense)
_SUBLANE = 8           # f32 sublane: batch padded to a multiple of this
_BATCH_TILE = 1024     # max batch tile for the grid path (swept: 1024-2048 ~ roofline)
_SMALL_BATCH_MAX = 128 # <= this many (padded) rows: gridless, fully VMEM-resident path


def _round_up(n, m):
    return ((n + m - 1) // m) * m


def _fused_mlp_kernel(*refs, n_layers):
    """refs = (x, w0, b0, w1, b1, ..., w_{L-1}, b_{L-1}, out).

    y = Linear_{L-1}( sin(...sin(Linear_0(x))...) ); final layer has no sin.
    Intermediates never touch HBM; single lane-dense store at the end.
    """
    x_ref = refs[0]
    o_ref = refs[-1]
    wb = refs[1:-1]
    h = x_ref[...].astype(jnp.float32)
    for i in range(n_layers):
        w = wb[2 * i][...]                      # [din(_p), dout_p], f32 or bf16
        b = wb[2 * i + 1][...]                  # (1, dout_p) f32, broadcasts over rows
        h = jnp.dot(h.astype(w.dtype), w, preferred_element_type=jnp.float32) + b
        if i < n_layers - 1:                    # last Linear has no activation
            h = jnp.sin(h)                      # f32 (EUP/VALU) — safe on v5e/v6e/v7x
    o_ref[...] = h.astype(o_ref.dtype)


def init_model_arch(layers, key):
    """Deterministic params matching nn.Linear shapes, stored as (w:[in,out], b:[out])."""
    params = []
    for idx in range(len(layers) - 1):
        fan_in, fan_out = layers[idx], layers[idx + 1]
        key, kw, kb = jax.random.split(key, 3)
        bound = 1.0 / jnp.sqrt(jnp.float32(fan_in))
        w = jax.random.uniform(kw, (fan_in, fan_out), jnp.float32, -bound, bound)
        b = jax.random.uniform(kb, (fan_out,), jnp.float32, -bound, bound)
        params.append((w, b))
    return params


def pad_params(params, compute_dtype=jnp.float32):
    """Pad ONCE outside the forward pass.

    Output dims padded to multiples of 128 (lane-dense); the FIRST layer's input
    dim is left unpadded (matches raw x); later layers' input dims follow the
    previous layer's padded output. Weights optionally cast to bf16 for the MXU;
    biases stay f32 (added in f32 inside the kernel).
    """
    flat = []
    for li, (w, b) in enumerate(params):
        din, dout = w.shape
        din_p = din if li == 0 else _round_up(din, _LANE)
        dout_p = _round_up(dout, _LANE)
        wp = jnp.pad(w, ((0, din_p - din), (0, dout_p - dout))).astype(compute_dtype)
        bp = jnp.pad(b.reshape(1, dout), ((0, 0), (0, dout_p - dout)))  # f32
        flat += [wp, bp]
    return tuple(flat)


@functools.partial(jax.jit, static_argnames=("out_dim",))
def model_arch_forward(flat_padded, x, *, out_dim):
    """ModelArch.forward: (Linear -> sin) * (L-2) then final Linear, fused in one kernel."""
    n_layers = len(flat_padded) // 2
    B, din = x.shape
    dout_p = flat_padded[-2].shape[1]

    Bp = _round_up(B, _SUBLANE)
    xp = x if Bp == B else jnp.pad(x, ((0, Bp - B), (0, 0)))  # batch pad only (no lane pad)

    kernel = functools.partial(_fused_mlp_kernel, n_layers=n_layers)
    n_in = 1 + len(flat_padded)

    weights = flat_padded[0::2]
    weight_bytes = sum(a.size * a.dtype.itemsize for a in flat_padded)
    flops = 2 * Bp * sum(w.shape[0] * w.shape[1] for w in weights)
    transcendentals = Bp * sum(w.shape[1] for w in weights[:-1])  # sin on hidden layers
    bytes_accessed = xp.size * xp.dtype.itemsize + weight_bytes + Bp * dout_p * 4
    cost = pl.CostEstimate(flops=flops, transcendentals=transcendentals,
                           bytes_accessed=bytes_accessed)

    if Bp <= _SMALL_BATCH_MAX:
        # Tiny batch: no grid, everything (x, weights, out) resident in VMEM.
        vmem_need = weight_bytes + (xp.size + 4 * Bp * dout_p) * 4 + (1 << 20)
        out_p = pl.pallas_call(
            kernel,
            out_shape=jax.ShapeDtypeStruct((Bp, dout_p), x.dtype),
            in_specs=[pl.BlockSpec(memory_space=pltpu.MemorySpace.VMEM)] * n_in,
            out_specs=pl.BlockSpec(memory_space=pltpu.MemorySpace.VMEM),
            compiler_params=pltpu.CompilerParams(
                vmem_limit_bytes=int(min(max(2 * vmem_need, 32 << 20), 64 << 20)),
            ),
            cost_estimate=cost,
        )(xp, *flat_padded)
    else:
        # Batch-tiled path: "parallel" grid axis (megacore shard on v7x), at least
        # 2 grid steps; weights/biases are full-array blocks reused every step.
        tb = min(_BATCH_TILE, _round_up((Bp + 1) // 2, _SUBLANE))
        n_blocks = pl.cdiv(Bp, tb)  # ragged last block: OOB rows masked on writeback
        wb_specs = [pl.BlockSpec(a.shape, lambda i: (0, 0)) for a in flat_padded]
        vmem_need = (weight_bytes
                     + 2 * tb * (din + dout_p) * 4      # double-buffered x/out tiles
                     + 2 * tb * dout_p * 4              # live intermediate h
                     + (1 << 20))
        out_p = pl.pallas_call(
            kernel,
            out_shape=jax.ShapeDtypeStruct((Bp, dout_p), x.dtype),
            grid_spec=pl.GridSpec(
                grid=(n_blocks,),
                in_specs=[pl.BlockSpec((tb, din), lambda i: (i, 0))] + wb_specs,
                out_specs=pl.BlockSpec((tb, dout_p), lambda i: (i, 0)),
            ),
            compiler_params=pltpu.CompilerParams(
                dimension_semantics=("parallel",),
                vmem_limit_bytes=int(min(max(2 * vmem_need, 32 << 20), 64 << 20)),
            ),
            cost_estimate=cost,
        )(xp, *flat_padded)
        # TODO(synk): for very wide layers (weight residency approaching v7x's 64 MiB
        # VMEM), add a K/N "arbitrary" tiling axis with a VMEM f32 accumulator instead
        # of keeping all weights resident.

    return out_p[:B, :out_dim]


def _ref_forward(params, x):
    ref = x
    for i, (w, b) in enumerate(params):
        ref = ref @ w + b
        if i < len(params) - 1:
            ref = jnp.sin(ref)
    return ref


if __name__ == "__main__":
    # layers spec like the PyTorch constructor: ModelArch(layers)
    layers = [32, 64, 64, 16]
    batch = 8

    key = jax.random.PRNGKey(0)
    key, kx = jax.random.split(key)
    x = jax.random.normal(kx, (batch, layers[0]), jnp.float32)

    params = init_model_arch(layers, key)

    # --- f32 MXU path (faithful to the PyTorch module), small-batch gridless kernel ---
    flat_f32 = pad_params(params, compute_dtype=jnp.float32)   # padded once, reused
    out = jax.block_until_ready(model_arch_forward(flat_f32, x, out_dim=layers[-1]))
    assert out.shape == (batch, layers[-1]), out.shape
    ref = _ref_forward(params, x)
    assert jnp.allclose(out, ref, atol=1e-5, rtol=1e-5)

    # --- bf16-weight MXU path (v5e/v6e throughput option), relaxed tolerance ---
    flat_bf16 = pad_params(params, compute_dtype=jnp.bfloat16)
    out_bf16 = jax.block_until_ready(model_arch_forward(flat_bf16, x, out_dim=layers[-1]))
    assert jnp.allclose(out_bf16, ref, atol=5e-2, rtol=5e-2)

    # --- batch-tiled grid path (ragged last block, parallel grid axis) ---
    key, kx2 = jax.random.split(key)
    xb = jax.random.normal(kx2, (340, layers[0]), jnp.float32)
    out_big = jax.block_until_ready(model_arch_forward(flat_f32, xb, out_dim=layers[-1]))
    assert out_big.shape == (340, layers[-1]), out_big.shape
    ref_big = _ref_forward(params, xb)
    assert jnp.allclose(out_big, ref_big, atol=1e-4, rtol=1e-4)

    print("KERNEL_OK")
</pallas_src>

<mosaic_0001>
module attributes {stable_mosaic.version = 11 : i64} {
  func.func @_fused_mlp_kernel(%arg0: memref<8x32xf32, #tpu.memory_space<vmem>>, %arg1: memref<32x128xf32, #tpu.memory_space<vmem>>, %arg2: memref<1x128xf32, #tpu.memory_space<vmem>>, %arg3: memref<128x128xf32, #tpu.memory_space<vmem>>, %arg4: memref<1x128xf32, #tpu.memory_space<vmem>>, %arg5: memref<128x128xf32, #tpu.memory_space<vmem>>, %arg6: memref<1x128xf32, #tpu.memory_space<vmem>>, %arg7: memref<8x128xf32, #tpu.memory_space<vmem>>) attributes {dimension_semantics = [], scalar_prefetch = 0 : i64, scratch_operands = 0 : i64, tpu.core_type = #tpu.core_type<tc>} {
    %c0 = arith.constant 0 : index
    %c0_0 = arith.constant 0 : index
    %0 = vector.load %arg0[%c0, %c0_0] : memref<8x32xf32, #tpu.memory_space<vmem>>, vector<8x32xf32>
    %c0_1 = arith.constant 0 : index
    %c0_2 = arith.constant 0 : index
    %1 = vector.load %arg1[%c0_1, %c0_2] : memref<32x128xf32, #tpu.memory_space<vmem>>, vector<32x128xf32>
    %c0_3 = arith.constant 0 : index
    %c0_4 = arith.constant 0 : index
    %2 = vector.load %arg2[%c0_3, %c0_4] : memref<1x128xf32, #tpu.memory_space<vmem>>, vector<1x128xf32>
    %cst = arith.constant dense<0.000000e+00> : vector<8x128xf32>
    %3 = tpu.matmul %0, %1, %cst {dimension_numbers = #tpu.dot_dimension_numbers<[1], [0], [0], [1], [0, 0, 1, 1], [], []>} : vector<8x32xf32>, vector<32x128xf32>, vector<8x128xf32> -> vector<8x128xf32>
    %4 = vector.broadcast %2 : vector<1x128xf32> to vector<8x128xf32>
    %5 = arith.addf %3, %4 : vector<8x128xf32>
    %6 = math.sin %5 : vector<8x128xf32>
    %c0_5 = arith.constant 0 : index
    %c0_6 = arith.constant 0 : index
    %7 = vector.load %arg3[%c0_5, %c0_6] : memref<128x128xf32, #tpu.memory_space<vmem>>, vector<128x128xf32>
    %c0_7 = arith.constant 0 : index
    %c0_8 = arith.constant 0 : index
    %8 = vector.load %arg4[%c0_7, %c0_8] : memref<1x128xf32, #tpu.memory_space<vmem>>, vector<1x128xf32>
    %cst_9 = arith.constant dense<0.000000e+00> : vector<8x128xf32>
    %9 = tpu.matmul %6, %7, %cst_9 {dimension_numbers = #tpu.dot_dimension_numbers<[1], [0], [0], [1], [0, 0, 1, 1], [], []>} : vector<8x128xf32>, vector<128x128xf32>, vector<8x128xf32> -> vector<8x128xf32>
    %10 = vector.broadcast %8 : vector<1x128xf32> to vector<8x128xf32>
    %11 = arith.addf %9, %10 : vector<8x128xf32>
    %12 = math.sin %11 : vector<8x128xf32>
    %c0_10 = arith.constant 0 : index
    %c0_11 = arith.constant 0 : index
    %13 = vector.load %arg5[%c0_10, %c0_11] : memref<128x128xf32, #tpu.memory_space<vmem>>, vector<128x128xf32>
    %c0_12 = arith.constant 0 : index
    %c0_13 = arith.constant 0 : index
    %14 = vector.load %arg6[%c0_12, %c0_13] : memref<1x128xf32, #tpu.memory_space<vmem>>, vector<1x128xf32>
    %cst_14 = arith.constant dense<0.000000e+00> : vector<8x128xf32>
    %15 = tpu.matmul %12, %13, %cst_14 {dimension_numbers = #tpu.dot_dimension_numbers<[1], [0], [0], [1], [0, 0, 1, 1], [], []>} : vector<8x128xf32>, vector<128x128xf32>, vector<8x128xf32> -> vector<8x128xf32>
    %16 = vector.broadcast %14 : vector<1x128xf32> to vector<8x128xf32>
    %17 = arith.addf %15, %16 : vector<8x128xf32>
    %c0_15 = arith.constant 0 : index
    %c0_16 = arith.constant 0 : index
    %18 = vector.load %arg7[%c0_15, %c0_16] : memref<8x128xf32, #tpu.memory_space<vmem>>, vector<8x128xf32>
    tpu.vector_store %arg7[%c0_15, %c0_16], %17 {strides = array<i32>} : memref<8x128xf32, #tpu.memory_space<vmem>>, vector<8x128xf32>,
    return
  }
}

</mosaic_0001>

<bundles_post_ra>
// kernel: model_arch_forward.1
= control target key start
LH: loop header
LB: loop body
LE: loop exit
PB: predicated region body
PF: predicated region fallthrough
CT: control target
= control target key end

     0   :  { %12 = vsyncpa [#allocation3], 0  ;;  %s1092_s0 = inlined_call_operand.vmem [shape: f32[8,32], index: 0, kind: input, shape index: {}]   ;;  %s1093_s1 = inlined_call_operand.hbm [shape: f32[32,128], index: 1, kind: input, shape index: {}]   ;;  %s1094_s2 = inlined_call_operand.vmem [shape: f32[1,128], index: 2, kind: input, shape index: {}]   ;;  %s1095_s3 = inlined_call_operand.hbm [shape: f32[128,128], index: 3, kind: input, shape index: {}]   ;;  %s1096_s4 = inlined_call_operand.vmem [shape: f32[1,128], index: 4, kind: input, shape index: {}]   ;;  %s1097_s5 = inlined_call_operand.hbm [shape: f32[128,128], index: 5, kind: input, shape index: {}]   ;;  %s1098_s6 = inlined_call_operand.vmem [shape: f32[1,128], index: 6, kind: input, shape index: {}]   ;;  %s1099_s7 = inlined_call_operand.hbm [shape: f32[8,128], index: 7, kind: output, shape index: {}]  }
   0x1   :  { %13 = vsyncpa [#allocation6], 0 }
   0x2   :  { %14 = vsyncpa [#allocation4], 0  ;;  %s876_s24 = smov [#allocation5]   ;;  %s877_s26 = smov [#allocation2]  }
   0x3   :  { %s36_s25 = sshll.u32 %s876_s24, 4  ;;  %s22_s27 = sshll.u32 %s877_s26, 4  ;;  %s37_s25 = int_to_ptr.vmem [resolvable:$true] %s36_s25  ;;  %s931_s27 = int_to_ptr.vmem [resolvable:$true] %s22_s27 }
   0x4   :  { %s782_s30 = scalar_lea.hbm %s1095_s3, 2048 }
   0x5   :  { %p783_p0 = scmp.ne.s32.totalorder %s1095_s3, %s782_s30  ;;  %p786_p1 = scmp.lt.u32.totalorder %s782_s30, %s1095_s3 }
   0x7   :  { %p788_p2 = pnand %p786_p1, %p783_p0 }
   0x9   :  { %791 = shalt.err (!%p788_p2)
}
   0xa   :  { %s792_s12 = scalar_lea.vmem %s37_s25, 2048  ;;  %p797_p4 = scmp.lt.s32.totalorder %s37_s25, %s37_s25 }
   0xb   :  { %p793_p3 = scmp.ne.s32.totalorder %s37_s25, %s792_s12  ;;  %p798_p5 = scmp.lt.s32.totalorder %s792_s12, %s792_s12 }
   0xd   :  { %p799_p6 = por %p798_p5, %p797_p4 }
   0xf   :  { %p800_p7 = pnand %p799_p6, %p793_p3 }
  0x11   :  { %803 = shalt.err (!%p800_p7)
}
  0x12   :  { %s878_s13 = smov 128   ;;  %s879_s14 = smov 8  }
  0x13   :  { %42 = dma.hbm_to_vmem [thread:$0]  %s1095_s3, 2048, %s37_s25, [#allocation6], %s878_s13, %s878_s13, %s879_s14  }
  0x14   :  { %s804_s19 = scalar_lea.hbm %s1093_s1, 512 }
  0x15   :  { %p805_p8 = scmp.ne.s32.totalorder %s1093_s1, %s804_s19  ;;  %p808_p9 = scmp.lt.u32.totalorder %s804_s19, %s1093_s1 }
  0x17   :  { %p810_p10 = pnand %p808_p9, %p805_p8 }
  0x19   :  { %813 = shalt.err (!%p810_p10)
}
  0x1a   :  { %s814_s24 = scalar_lea.vmem %s931_s27, 512  ;;  %p819_p12 = scmp.lt.s32.totalorder %s931_s27, %s931_s27 }
  0x1b   :  { %p815_p11 = scmp.ne.s32.totalorder %s931_s27, %s814_s24  ;;  %p820_p13 = scmp.lt.s32.totalorder %s814_s24, %s814_s24 }
  0x1d   :  { %p821_p0 = por %p820_p13, %p819_p12 }
  0x1f   :  { %p822_p1 = pnand %p821_p0, %p815_p11 }
  0x21   :  { %825 = shalt.err (!%p822_p1)
}
  0x22   :  { %28 = dma.hbm_to_vmem [thread:$0]  %s1093_s1, 512, %s931_s27, [#allocation3], %s878_s13, %s878_s13, %s879_s14  }
  0x23   :  { %s880_s26 = smov [#allocation7]   ;;  %s826_s8 = scalar_lea.hbm %s1097_s5, 2048 }
  0x24   :  { %s50_s28 = sshll.u32 %s880_s26, 4  ;;  %p827_p2 = scmp.ne.s32.totalorder %s1097_s5, %s826_s8  ;;  %s51_s28 = int_to_ptr.vmem [resolvable:$true] %s50_s28 }
  0x25   :  { %p830_p3 = scmp.lt.u32.totalorder %s826_s8, %s1097_s5 }
  0x27   :  { %p832_p4 = pnand %p830_p3, %p827_p2 }
  0x29   :  { %835 = shalt.err (!%p832_p4)
}
  0x2a   :  { %s836_s15 = scalar_lea.vmem %s51_s28, 2048  ;;  %p841_p6 = scmp.lt.s32.totalorder %s51_s28, %s51_s28 }
  0x2b   :  { %p837_p5 = scmp.ne.s32.totalorder %s51_s28, %s836_s15  ;;  %p842_p7 = scmp.lt.s32.totalorder %s836_s15, %s836_s15 }
  0x2d   :  { %p843_p8 = por %p842_p7, %p841_p6 }
  0x2f   :  { %p844_p9 = pnand %p843_p8, %p837_p5 }
  0x31   :  { %847 = shalt.err (!%p844_p9)
}
  0x32   :  { %56 = dma.hbm_to_vmem [thread:$0]  %s1097_s5, 2048, %s51_s28, [#allocation6], %s878_s13, %s878_s13, %s879_s14  }
  0x33   :  { %870 = dma.done.wait [#allocation3], 512  }
  0x34   :  { %871 = vsyncadd [#allocation3], 4294966784 }
  0x35   :  { %872 = dma.done.wait [#allocation6], 4096  }
  0x36   :  { %873 = vsyncadd [#allocation6], 4294963200  ;;  %v881_v0 = vmov 0.0|0.0   ;;  %vm882_vm0 = vmmov 0   ;;  %v883_v1 = vmov 0.0   ;;  %v69_v2 = vld [vmem:[#allocation2] sm:$0xff] }
  0x37   :  { %697 = vmatprep.subr.bf16.mxu0 %v881_v0  ;;  %624 = vmatprep.mubr.msk.f32.mxu0 %vm882_vm0, %v883_v1  ;;  %v70_v3 = vld [vmem:[#allocation2 + $0x8] sm:$0xff]  ;;  %v71_v4 = vld [vmem:[#allocation2 + $0x10] sm:$0xff]  ;;  %v72_v6 = vld [vmem:[#allocation2 + $0x18] sm:$0xff]  ;;  %vm80_vm1 = vcmask 261120   ;;  %v884_v47 = vmov 683565275  }
  0x38   :  { %703 = vmatprep.subr.bf16.mxu1 %v881_v0  ;;  %659 = vmatprep.mubr.msk.f32.mxu1 %vm882_vm0, %v883_v1  ;;  %v698_v5 = vpack.c.bf16 %v70_v3, %v69_v2  ;;  %v701_v7 = vpack.c.bf16 %v72_v6, %v71_v4  ;;  %v68_v8 = vld [vmem:[%s1092_s0] sm:$0xff]  ;;  %v259_v10 = vld [vmem:[#allocation5 + $0x8] sm:$0xff]  ;;  %v260_v12 = vld [vmem:[#allocation5 + $0x10] sm:$0xff]  ;;  %v885_v49 = vmov 2475754826   ;;  %s890_s18 = smov [#allocation8]  }
  0x39   :  { %v258_v9 = vld [vmem:[#allocation5] sm:$0xff]  ;;  %v261_v13 = vld [vmem:[#allocation5 + $0x18] sm:$0xff]  ;;  %v263_v16 = vld [vmem:[#allocation5 + $0x28] sm:$0xff]  ;;  %v886_v52 = vmov 2131351028   ;;  %s555_s19 = sshll.u32 %s890_s18, 4  ;;  %s556_s19 = int_to_ptr.vmem [resolvable:$true] %s555_s19 }
  0x3a   :  { %699 = vmatpush3.bf16.msra.mxu0 %v698_v5  ;;  %v704_v11 = vpack.c.bf16 %v259_v10, %v258_v9  ;;  %v707_v14 = vpack.c.bf16 %v261_v13, %v260_v12  ;;  %v262_v15 = vld [vmem:[#allocation5 + $0x20] sm:$0xff]  ;;  %v264_v18 = vld [vmem:[#allocation5 + $0x30] sm:$0xff]  ;;  %v265_v19 = vld [vmem:[#allocation5 + $0x38] sm:$0xff]  ;;  %v887_v55 = vmov 2102212464   ;;  %s848_s20 = scalar_lea.vmem %s556_s19, 128  ;;  %p853_p11 = scmp.lt.s32.totalorder %s556_s19, %s556_s19 }
  0x3b   :  { %700 = vmatprep.subr.bf16.mxu0 %v881_v0  ;;  %v710_v17 = vpack.c.bf16 %v263_v16, %v262_v15  ;;  %v713_v20 = vpack.c.bf16 %v265_v19, %v264_v18  ;;  %v266_v21 = vld [vmem:[#allocation5 + $0x40] sm:$0xff]  ;;  %v267_v22 = vld [vmem:[#allocation5 + $0x48] sm:$0xff]  ;;  %v268_v24 = vld [vmem:[#allocation5 + $0x50] sm:$0xff]  ;;  %v888_v58 = vmov 920167782   ;;  %p849_p10 = scmp.ne.s32.totalorder %s556_s19, %s848_s20  ;;  %p854_p12 = scmp.lt.s32.totalorder %s848_s20, %s848_s20 }
  0x3c   :  { %705 = vmatpush3.bf16.msra.mxu1 %v704_v11  ;;  %v716_v23 = vpack.c.bf16 %v267_v22, %v266_v21  ;;  %v269_v25 = vld [vmem:[#allocation5 + $0x58] sm:$0xff]  ;;  %v270_v27 = vld [vmem:[#allocation5 + $0x60] sm:$0xff]  ;;  %v271_v28 = vld [vmem:[#allocation5 + $0x68] sm:$0xff]  ;;  %v889_v61 = vmov 1326507024  }
  0x3d   :  { %706 = vmatprep.subr.bf16.mxu1 %v881_v0  ;;  %v719_v26 = vpack.c.bf16 %v269_v25, %v268_v24  ;;  %v722_v29 = vpack.c.bf16 %v271_v28, %v270_v27  ;;  %v272_v30 = vld [vmem:[#allocation5 + $0x70] sm:$0xff]  ;;  %v273_v31 = vld [vmem:[#allocation5 + $0x78] sm:$0xff]  ;;  %v565_v33 = vld [vmem:[%s1094_s2] ss:$0 sm:$0xff]  ;;  %p855_p13 = por %p854_p12, %p853_p11 }
  0x3e   :  { %702 = vmatpush3.bf16.msra.mxu0 %v701_v7  ;;  %v725_v32 = vpack.c.bf16 %v273_v31, %v272_v30 }
  0x3f   :  { %727 = vmatprep.subr.bf16.mxu0 %v881_v0  ;;  %p856_p0 = pnand %p855_p13, %p849_p10 }
  0x40   :  { %708 = vmatpush3.bf16.msra.mxu1 %v707_v14 }
  0x41   :  { %625 = vmatmul.mubr.msk.f32.vlgmr.msra.gmra.mrb[0].mxu0 %vm80_vm1, %v68_v8  ;;  %709 = vmatprep.subr.bf16.mxu1 %v881_v0 }
  0x42   :  { %694 = vmatprep.mubr.msk.f32.mxu0 %vm882_vm0, %v883_v1 }
  0x44   :  { %711 = vmatpush3.bf16.msra.mxu1 %v710_v17 }
  0x45   :  { %712 = vmatprep.subr.bf16.mxu1 %v881_v0 }
  0x48   :  { %714 = vmatpush3.bf16.msra.mxu1 %v713_v20 }
  0x49   :  { %715 = vmatprep.subr.bf16.mxu1 %v881_v0 }
  0x4c   :  { %717 = vmatpush3.bf16.msra.mxu1 %v716_v23 }
  0x4d   :  { %718 = vmatprep.subr.bf16.mxu1 %v881_v0 }
  0x50   :  { %720 = vmatpush3.bf16.msra.mxu1 %v719_v26 }
  0x51   :  { %721 = vmatprep.subr.bf16.mxu1 %v881_v0 }
  0x54   :  { %723 = vmatpush3.bf16.msra.mxu1 %v722_v29 }
  0x55   :  { %724 = vmatprep.subr.bf16.mxu1 %v881_v0 }
  0x58   :  { %726 = vmatpush3.bf16.msra.mxu1 %v725_v32 }
 0x114   :  { %v150_v34 = vpop.f32.mrb[0].mxu0 }
 0x115   :  { %v1003_v35 = vadd.f32 %v565_v33, %v150_v34  ;;  %v626_v36 = vpop.f32.mrb[1].mxu0 }
 0x117   :  { %v157_v37 = vand.u32 2139095040, %v1003_v35  ;;  %v154_v41 = vand.u32 2147483647, %v1003_v35  ;;  %vm156_vm9 = vcmp.lt.s32.totalorder %v1003_v35, 0  ;;  %vm246_vm14 = vweird.f32 %v1003_v35 }
 0x119   :  { %v158_v38 = vshrl.u32 %v157_v37, 23  ;;  %v161_v44 = vand.u32 8388607, %v154_v41  ;;  %vm155_vm10 = vcmp.le.f32.partialorder %v154_v41, 0.7853982 }
 0x11b   :  { %v567_v39 = vadd.s32 4294967169, %v158_v38  ;;  %v162_v63 = vor.u32 8388608, %v161_v44 }
 0x11d   :  { %v164_v40 = vadd.s32 1, %v567_v39  ;;  %v202_v14 = vshll.u32 %v162_v63, 8 }
 0x11f   :  { %vm165_vm2 = vcmp.gt.s32.totalorder %v164_v40, 0 }
 0x120   :  { %v166_v42 = vsel %vm165_vm2, %v164_v40, 0 }
 0x121   :  { %v168_v43 = vand.u32 31, %v166_v42  ;;  %v167_v46 = vshrl.u32 %v166_v42, 5 }
 0x123   :  { %v169_v45 = vsub.s32 32, %v168_v43  ;;  %v171_v48 = vshll.u32 %v884_v47, %v168_v43  ;;  %v174_v50 = vshll.u32 %v885_v49, %v168_v43  ;;  %v177_v54 = vshll.u32 %v886_v52, %v168_v43 }
 0x124   :  { %v180_v57 = vshll.u32 %v887_v55, %v168_v43  ;;  %v183_v60 = vshll.u32 %v888_v58, %v168_v43  ;;  %vm186_vm3 = vcmp.lt.s32.totalorder %v167_v46, 1  ;;  %vm189_vm4 = vcmp.lt.s32.totalorder %v167_v46, 4 }
 0x125   :  { %v172_v51 = vshrl.u32 %v885_v49, %v169_v45  ;;  %v175_v53 = vshrl.u32 %v886_v52, %v169_v45  ;;  %v178_v56 = vshrl.u32 %v887_v55, %v169_v45  ;;  %v181_v59 = vshrl.u32 %v888_v58, %v169_v45 }
 0x126   :  { %v184_v62 = vshrl.u32 %v889_v61, %v169_v45  ;;  %v170_v9 = vshrl.u32 %v884_v47, %v169_v45  ;;  %vm188_vm5 = vcmp.lt.s32.totalorder %v167_v46, 3  ;;  %vm187_vm6 = vcmp.lt.s32.totalorder %v167_v46, 2 }
 0x127   :  { %v173_v1 = vor.u32 %v172_v51, %v171_v48  ;;  %v176_v2 = vor.u32 %v175_v53, %v174_v50  ;;  %v179_v3 = vor.u32 %v178_v56, %v177_v54  ;;  %v182_v4 = vor.u32 %v181_v59, %v180_v57 }
 0x128   :  { %v185_v5 = vor.u32 %v184_v62, %v183_v60 }
 0x129   :  { %v191_v6 = vsel %vm189_vm4, %v179_v3, 2102212464  ;;  %v194_v7 = vsel %vm186_vm3, %v173_v1, %v176_v2  ;;  %v198_v8 = vsel %vm186_vm3, %v176_v2, %v179_v3  ;;  %v195_v10 = vsel %vm189_vm4, %v182_v4, 920167782 }
 0x12a   :  { %v199_v11 = vsel %vm189_vm4, %v185_v5, 1326507024  ;;  %v196_v12 = vsel %vm188_vm5, %v179_v3, %v195_v10  ;;  %v190_v15 = vsel %vm186_vm3, %v170_v9, %v173_v1  ;;  %v192_v16 = vsel %vm188_vm5, %v176_v2, %v191_v6  ;;  %v455_v9 = vld [vmem:[#allocation7] sm:$0xff]  ;;  %v456_v10 = vld [vmem:[#allocation7 + $0x8] sm:$0xff] }
 0x12b   :  { %v200_v13 = vsel %vm188_vm5, %v182_v4, %v199_v11  ;;  %v197_v17 = vsel %vm187_vm6, %v194_v7, %v196_v12  ;;  %v193_v23 = vsel %vm187_vm6, %v190_v15, %v192_v16  ;;  %v728_v11 = vpack.c.bf16 %v456_v10, %v455_v9  ;;  %v457_v12 = vld [vmem:[#allocation7 + $0x10] sm:$0xff]  ;;  %v459_v15 = vld [vmem:[#allocation7 + $0x20] sm:$0xff]  ;;  %v460_v16 = vld [vmem:[#allocation7 + $0x28] sm:$0xff] }
 0x12c   :  { %v201_v18 = vsel %vm187_vm6, %v198_v8, %v200_v13  ;;  %v1023_v21 = vmul.u32.u64.low %v202_v14, %v197_v17  ;;  %v1024_v22 = vmul.u32.u64.high %v202_v14, %v197_v17, %v1023_v21  ;;  %v209_v25 = vmul.u32 %v202_v14, %v193_v23  ;;  %v458_v13 = vld [vmem:[#allocation7 + $0x18] sm:$0xff]  ;;  %v465_v23 = vld [vmem:[#allocation7 + $0x50] sm:$0xff] }
 0x12d   :  { %v1020_v19 = vmul.u32.u64.low %v202_v14, %v201_v18  ;;  %v1021_v20 = vmul.u32.u64.high %v202_v14, %v201_v18, %v1020_v19  ;;  %729 = vmatpush3.bf16.msra.mxu0 %v728_v11  ;;  %v731_v14 = vpack.c.bf16 %v458_v13, %v457_v12  ;;  %v734_v17 = vpack.c.bf16 %v460_v16, %v459_v15  ;;  %v462_v18 = vld [vmem:[#allocation7 + $0x38] sm:$0xff] }
 0x12e   :  { %v212_v24 = vadd.s32 1, %v1024_v22  ;;  %730 = vmatprep.subr.bf16.mxu0 %v881_v0 }
 0x12f   :  { %vm211_vm7 = vc.u32 %v1021_v20, %v1023_v21  ;;  %v210_v38 = vadd.s32 %v1023_v21, %v1021_v20  ;;  %v463_v20 = vld [vmem:[#allocation7 + $0x40] sm:$0xff]  ;;  %v464_v21 = vld [vmem:[#allocation7 + $0x48] sm:$0xff] }
 0x130   :  { %v213_v26 = vsel %vm211_vm7, %v212_v24, %v1024_v22  ;;  %v740_v22 = vpack.c.bf16 %v464_v21, %v463_v20  ;;  %v466_v24 = vld [vmem:[#allocation7 + $0x58] sm:$0xff] }
 0x131   :  { %v214_v27 = vadd.s32 %v213_v26, %v209_v25  ;;  %732 = vmatpush3.bf16.msra.mxu0 %v731_v14  ;;  %v743_v25 = vpack.c.bf16 %v466_v24, %v465_v23  ;;  %v467_v26 = vld [vmem:[#allocation7 + $0x60] sm:$0xff] }
 0x132   :  { %733 = vmatprep.subr.bf16.mxu0 %v881_v0 }
 0x133   :  { %v215_v28 = vadd.s32 536870912, %v214_v27 }
 0x135   :  { %v216_v29 = vshrl.u32 %v215_v28, 30  ;;  %735 = vmatpush3.bf16.msra.mxu0 %v734_v17 }
 0x136   :  { %736 = vmatprep.subr.bf16.mxu0 %v881_v0 }
 0x137   :  { %v217_v30 = vshll.u32 %v216_v29, 30  ;;  %v240_v54 = vsub.s32 4, %v216_v29 }
 0x139   :  { %v218_v31 = vsub.s32 %v214_v27, %v217_v30  ;;  %v241_v59 = vsel %vm156_vm9, %v240_v54, %v216_v29  ;;  %v468_v27 = vld [vmem:[#allocation7 + $0x68] sm:$0xff]  ;;  %v469_v29 = vld [vmem:[#allocation7 + $0x70] sm:$0xff]  ;;  %v470_v30 = vld [vmem:[#allocation7 + $0x78] sm:$0xff] }
 0x13a   :  { %v243_v62 = vsel %vm155_vm10, 0, %v241_v59  ;;  %v746_v28 = vpack.c.bf16 %v468_v27, %v467_v26 }
 0x13b   :  { %v220_v32 = vsub.s32 0, %v218_v31  ;;  %v247_v63 = vadd.s32 3, %v243_v62 }
 0x13d   :  { %v568_v33 = vmin.u32 %v220_v32, %v218_v31  ;;  %v248_v1 = vand.u32 3, %v247_v63  ;;  %v571_v32 = vld [vmem:[%s1096_s4] ss:$0 sm:$0xff] }
 0x13f   :  { %v222_v34 = vclz %v568_v33  ;;  %vm253_vm11 = vcmp.eq.s32.totalorder %v248_v1, 2  ;;  %vm250_vm12 = vcmp.eq.s32.totalorder %v248_v1, 0  ;;  %vm249_vm13 = vcmp.lt.s32.totalorder %v248_v1, 2 }
 0x141   :  { %v569_v36 = vadd.s32 4294967294, %v222_v34 }
 0x143   :  { %vm570_vm8 = vcmp.lt.s32.totalorder %v569_v36, 0 }
 0x144   :  { %v225_v37 = vsel %vm570_vm8, 0, %v569_v36 }
 0x145   :  { %v226_v39 = vsub.s32 32, %v225_v37  ;;  %v230_v40 = vsub.s32 4294967266, %v225_v37  ;;  %v227_v42 = vshll.u32 %v218_v31, %v225_v37  ;;  %v749_v31 = vpack.c.bf16 %v470_v30, %v469_v29 }
 0x147   :  { %v228_v43 = vshrl.u32 %v210_v38, %v226_v39  ;;  %v231_v44 = vadd.s32 127, %v230_v40 }
 0x149   :  { %v229_v45 = vor.u32 %v228_v43, %v227_v42  ;;  %v232_v46 = vshll.u32 %v231_v44, 23 }
 0x14b   :  { %v233_v48 = vor.u32 4788187, %v232_v46  ;;  %v236_v51 = vcvt.s32.f32 %v229_v45 }
 0x14d   :  { %v234_v50 = vand.u32 2147483647, %v233_v48 }
 0x14f   :  { %v237_v53 = vmul.f32 %v236_v51, %v234_v50 }
 0x151   :  { %v238_v56 = vxor.u32 2147483648, %v237_v53 }
 0x153   :  { %v239_v57 = vsel %vm156_vm9, %v238_v56, %v237_v53 }
 0x154   :  { %v242_v60 = vsel %vm155_vm10, %v1003_v35, %v239_v57  ;;  %v461_v35 = vld [vmem:[#allocation7 + $0x30] sm:$0xff] }
 0x155   :  { %774 = vcosq.f32 %v242_v60  ;;  %v737_v19 = vpack.c.bf16 %v462_v18, %v461_v35 }
 0x156   :  { %776 = vsinq.f32 %v242_v60 }
 0x157   :  { %738 = vmatpush3.bf16.msra.mxu0 %v737_v19 }
 0x158   :  { %739 = vmatprep.subr.bf16.mxu0 %v881_v0 }
 0x15b   :  { %741 = vmatpush3.bf16.msra.mxu0 %v740_v22 }
 0x15c   :  { %742 = vmatprep.subr.bf16.mxu0 %v881_v0 }
 0x15f   :  { %v775_v2 = vpop.eup %774  ;;  %744 = vmatpush3.bf16.msra.mxu0 %v743_v25 }
 0x160   :  { %v777_v3 = vpop.eup %776  ;;  %v254_v4 = vxor.u32 2147483648, %v775_v2  ;;  %745 = vmatprep.subr.bf16.mxu0 %v881_v0 }
 0x161   :  { %v251_v5 = vxor.u32 2147483648, %v777_v3 }
 0x162   :  { %v255_v6 = vsel %vm253_vm11, %v254_v4, %v777_v3 }
 0x163   :  { %v252_v7 = vsel %vm250_vm12, %v775_v2, %v251_v5  ;;  %747 = vmatpush3.bf16.msra.mxu0 %v746_v28 }
 0x164   :  { %v256_v41 = vsel %vm249_vm13, %v252_v7, %v255_v6  ;;  %748 = vmatprep.subr.bf16.mxu0 %v881_v0 }
 0x165   :  { %v257_v8 = vsel %vm246_vm14, nan, %v256_v41 }
 0x166   :  { %660 = vmatmul.mubr.f32.vlgmr.msra.gmra.mrb[0].mxu1 %v257_v8 }
 0x167   :  { %750 = vmatpush3.bf16.msra.mxu0 %v749_v31 }
 0x239   :  { %v347_v33 = vpop.f32.mrb[0].mxu1 }
 0x23a   :  { %v1045_v34 = vadd.f32 %v571_v32, %v347_v33  ;;  %v661_v36 = vpop.f32.mrb[1].mxu1 }
 0x23c   :  { %v354_v37 = vand.u32 2139095040, %v1045_v34  ;;  %v351_v42 = vand.u32 2147483647, %v1045_v34  ;;  %vm353_vm6 = vcmp.lt.s32.totalorder %v1045_v34, 0  ;;  %vm443_vm11 = vweird.f32 %v1045_v34 }
 0x23e   :  { %v355_v38 = vshrl.u32 %v354_v37, 23  ;;  %v358_v0 = vand.u32 8388607, %v351_v42  ;;  %vm352_vm7 = vcmp.le.f32.partialorder %v351_v42, 0.7853982 }
 0x240   :  { %v572_v39 = vadd.s32 4294967169, %v355_v38  ;;  %v359_v63 = vor.u32 8388608, %v358_v0 }
 0x242   :  { %v361_v40 = vadd.s32 1, %v572_v39 }
 0x244   :  { %vm362_vm15 = vcmp.gt.s32.totalorder %v361_v40, 0 }
 0x245   :  { %v363_v43 = vsel %vm362_vm15, %v361_v40, 0 }
 0x246   :  { %v365_v44 = vand.u32 31, %v363_v43  ;;  %v364_v46 = vshrl.u32 %v363_v43, 5 }
 0x248   :  { %v366_v45 = vsub.s32 32, %v365_v44  ;;  %v368_v48 = vshll.u32 %v884_v47, %v365_v44  ;;  %v371_v50 = vshll.u32 %v885_v49, %v365_v44  ;;  %v374_v54 = vshll.u32 %v886_v52, %v365_v44 }
 0x249   :  { %v377_v57 = vshll.u32 %v887_v55, %v365_v44  ;;  %v380_v60 = vshll.u32 %v888_v58, %v365_v44  ;;  %vm383_vm0 = vcmp.lt.s32.totalorder %v364_v46, 1  ;;  %vm386_vm1 = vcmp.lt.s32.totalorder %v364_v46, 4 }
 0x24a   :  { %v369_v51 = vshrl.u32 %v885_v49, %v366_v45  ;;  %v372_v53 = vshrl.u32 %v886_v52, %v366_v45  ;;  %v375_v56 = vshrl.u32 %v887_v55, %v366_v45  ;;  %v378_v59 = vshrl.u32 %v888_v58, %v366_v45 }
 0x24b   :  { %v381_v62 = vshrl.u32 %v889_v61, %v366_v45  ;;  %v367_v7 = vshrl.u32 %v884_v47, %v366_v45  ;;  %vm385_vm2 = vcmp.lt.s32.totalorder %v364_v46, 3  ;;  %vm384_vm3 = vcmp.lt.s32.totalorder %v364_v46, 2 }
 0x24c   :  { %v370_v1 = vor.u32 %v369_v51, %v368_v48  ;;  %v373_v2 = vor.u32 %v372_v53, %v371_v50  ;;  %v376_v3 = vor.u32 %v375_v56, %v374_v54  ;;  %v379_v4 = vor.u32 %v378_v59, %v377_v57 }
 0x24d   :  { %v382_v49 = vor.u32 %v381_v62, %v380_v60  ;;  %v399_v61 = vshll.u32 %v359_v63, 8 }
 0x24e   :  { %v388_v5 = vsel %vm386_vm1, %v376_v3, 2102212464  ;;  %v391_v52 = vsel %vm383_vm0, %v370_v1, %v373_v2  ;;  %v395_v6 = vsel %vm383_vm0, %v373_v2, %v376_v3  ;;  %v392_v55 = vsel %vm386_vm1, %v379_v4, 920167782 }
 0x24f   :  { %v396_v41 = vsel %vm386_vm1, %v382_v49, 1326507024  ;;  %v393_v58 = vsel %vm385_vm2, %v376_v3, %v392_v55  ;;  %v387_v9 = vsel %vm383_vm0, %v367_v7, %v370_v1  ;;  %v389_v10 = vsel %vm385_vm2, %v373_v2, %v388_v5  ;;  %v576_v2 = vld [vmem:[%s1098_s6] ss:$0 sm:$0xff] }
 0x250   :  { %v397_v8 = vsel %vm385_vm2, %v379_v4, %v396_v41  ;;  %v394_v11 = vsel %vm384_vm3, %v391_v52, %v393_v58  ;;  %v390_v17 = vsel %vm384_vm3, %v387_v9, %v389_v10 }
 0x251   :  { %v398_v12 = vsel %vm384_vm3, %v395_v6, %v397_v8  ;;  %v1065_v15 = vmul.u32.u64.low %v399_v61, %v394_v11  ;;  %v1066_v16 = vmul.u32.u64.high %v399_v61, %v394_v11, %v1065_v15  ;;  %v406_v35 = vmul.u32 %v399_v61, %v390_v17 }
 0x252   :  { %v1062_v13 = vmul.u32.u64.low %v399_v61, %v398_v12  ;;  %v1063_v14 = vmul.u32.u64.high %v399_v61, %v398_v12, %v1062_v13 }
 0x253   :  { %v409_v47 = vadd.s32 1, %v1066_v16 }
 0x254   :  { %vm408_vm4 = vc.u32 %v1063_v14, %v1065_v15  ;;  %v407_v29 = vadd.s32 %v1065_v15, %v1063_v14 }
 0x255   :  { %v410_v18 = vsel %vm408_vm4, %v409_v47, %v1066_v16 }
 0x256   :  { %v411_v19 = vadd.s32 %v410_v18, %v406_v35 }
 0x258   :  { %v412_v20 = vadd.s32 536870912, %v411_v19 }
 0x25a   :  { %v413_v21 = vshrl.u32 %v412_v20, 30 }
 0x25c   :  { %v414_v22 = vshll.u32 %v413_v21, 30  ;;  %v437_v0 = vsub.s32 4, %v413_v21 }
 0x25e   :  { %v415_v23 = vsub.s32 %v411_v19, %v414_v22  ;;  %v438_v48 = vsel %vm353_vm6, %v437_v0, %v413_v21 }
 0x25f   :  { %v440_v51 = vsel %vm352_vm7, 0, %v438_v48 }
 0x260   :  { %v417_v24 = vsub.s32 0, %v415_v23  ;;  %v444_v53 = vadd.s32 3, %v440_v51 }
 0x262   :  { %v573_v25 = vmin.u32 %v417_v24, %v415_v23  ;;  %v445_v54 = vand.u32 3, %v444_v53 }
 0x264   :  { %v419_v26 = vclz %v573_v25  ;;  %vm450_vm8 = vcmp.eq.s32.totalorder %v445_v54, 2  ;;  %vm447_vm9 = vcmp.eq.s32.totalorder %v445_v54, 0  ;;  %vm446_vm10 = vcmp.lt.s32.totalorder %v445_v54, 2 }
 0x266   :  { %v574_v27 = vadd.s32 4294967294, %v419_v26 }
 0x268   :  { %vm575_vm5 = vcmp.lt.s32.totalorder %v574_v27, 0 }
 0x269   :  { %v422_v28 = vsel %vm575_vm5, 0, %v574_v27 }
 0x26a   :  { %v423_v30 = vsub.s32 32, %v422_v28  ;;  %v427_v31 = vsub.s32 4294967266, %v422_v28  ;;  %v424_v32 = vshll.u32 %v415_v23, %v422_v28 }
 0x26c   :  { %v425_v33 = vshrl.u32 %v407_v29, %v423_v30  ;;  %v428_v36 = vadd.s32 127, %v427_v31 }
 0x26e   :  { %v426_v37 = vor.u32 %v425_v33, %v424_v32  ;;  %v429_v38 = vshll.u32 %v428_v36, 23 }
 0x270   :  { %v430_v39 = vor.u32 4788187, %v429_v38  ;;  %v433_v43 = vcvt.s32.f32 %v426_v37 }
 0x272   :  { %v431_v40 = vand.u32 2147483647, %v430_v39 }
 0x274   :  { %v434_v44 = vmul.f32 %v433_v43, %v431_v40 }
 0x276   :  { %v435_v45 = vxor.u32 2147483648, %v434_v44 }
 0x278   :  { %v436_v46 = vsel %vm353_vm6, %v435_v45, %v434_v44 }
 0x279   :  { %v439_v50 = vsel %vm352_vm7, %v1045_v34, %v436_v46 }
 0x27a   :  { %778 = vcosq.f32 %v439_v50 }
 0x27b   :  { %780 = vsinq.f32 %v439_v50 }
 0x284   :  { %v779_v56 = vpop.eup %778 }
 0x285   :  { %v781_v57 = vpop.eup %780  ;;  %v451_v59 = vxor.u32 2147483648, %v779_v56 }
 0x286   :  { %v448_v60 = vxor.u32 2147483648, %v781_v57 }
 0x287   :  { %v452_v62 = vsel %vm450_vm8, %v451_v59, %v781_v57 }
 0x288   :  { %v449_v63 = vsel %vm447_vm9, %v779_v56, %v448_v60 }
 0x289   :  { %v453_v42 = vsel %vm446_vm10, %v449_v63, %v452_v62 }
 0x28a   :  { %v454_v1 = vsel %vm443_vm11, nan, %v453_v42 }
 0x28b   :  { %695 = vmatmul.mubr.f32.vlgmr.msra.gmra.mrb[2].mxu0 %v454_v1 }
 0x35e   :  { %v544_v3 = vpop.f32.mrb[2].mxu0 }
 0x35f   :  { %v545_v4 = vadd.f32 %v576_v2, %v544_v3  ;;  %v696_v49 = vpop.f32.mrb[3].mxu0 }
 0x361   :  { %548 = vst [vmem:[#allocation8] sm:$0xff] %v545_v4 }
 0x362   :  { %859 = shalt.err (!%p856_p0)
}
 0x363   :  { %s860_s23 = scalar_lea.hbm %s1099_s7, 128 }
 0x364   :  { %p861_p1 = scmp.ne.s32.totalorder %s1099_s7, %s860_s23  ;;  %p864_p2 = scmp.lt.u32.totalorder %s860_s23, %s1099_s7 }
 0x366   :  { %p866_p3 = pnand %p864_p2, %p861_p1 }
 0x368   :  { %869 = shalt.err (!%p866_p3)
}
 0x369   :  { %558 = dma.vmem_to_hbm [thread:$0]  %s556_s19, 128, %s1099_s7, [#allocation4]  }
 0x36a   :  { %874 = dma.done.wait [#allocation4], 128  }
 0x36b   :  { %875 = vsyncadd [#allocation4], 4294967168 }
 0x36c   :  { %562 = vsyncpa [#allocation3], 1 }
 0x36d   :  { %563 = vsyncpa [#allocation6], 1 }
 0x36e   :  { %564 = vsyncpa [#allocation4], 1 }

</bundles_post_ra>
